<compile_context>
chip_gen: v7x
topology: tpu7x:2x2x1
jax: 0.10.0
libtpu: 0.0.40
codegen_flags: <defaults>
</compile_context>

<pallas_src>
import jax
import jax.numpy as jnp
from jax.experimental import pallas as pl
from jax.experimental.pallas import tpu as pltpu


def _round_up(x, m):
    return ((x + m - 1) // m) * m


# ----------------------------------------------------------------------------
# Fused Pallas kernel: y_L = LReLU(IN(... LReLU(IN(x @ W0^T)) ... @ W{L-1}^T))
# ----------------------------------------------------------------------------
def _make_fused_mlp_kernel(num_layers, n_valid, eps, neg_slope):
    def kernel(*refs):
        # refs = (x_ref, w0_ref, ..., w{L-1}_ref, o_ref)
        x_ref = refs[0]
        w_refs = refs[1:1 + num_layers]
        o_ref = refs[1 + num_layers]

        x = x_ref[0]                                   # (N_pad, C0_pad), bf16
        n_pad = x.shape[0]
        # Padded rows (points) must not pollute the per-channel statistics.
        row_valid = (
            jax.lax.broadcasted_iota(jnp.int32, (n_pad, 1), 0) < n_valid
        )
        inv_n = jnp.float32(1.0 / n_valid)

        for li in range(num_layers):
            # Conv1d(kernel_size=1) == per-point linear -> MXU matmul.
            # Bias omitted: InstanceNorm(affine=False) cancels it exactly.
            y = jnp.dot(x, w_refs[li][...],
                        preferred_element_type=jnp.float32)   # (N_pad, C_out)
            y = jnp.where(row_valid, y, 0.0)
            # One-pass InstanceNorm statistics over the N valid points (f32).
            mean = jnp.sum(y, axis=0, keepdims=True) * inv_n
            ex2 = jnp.sum(y * y, axis=0, keepdims=True) * inv_n
            var = jnp.maximum(ex2 - mean * mean, 0.0)
            yn = (y - mean) * jax.lax.rsqrt(var + eps)
            act = jnp.where(yn > 0, yn, neg_slope * yn)
            if li + 1 < num_layers:
                x = act.astype(w_refs[li + 1].dtype)   # bf16 for next MXU pass
            else:
                o_ref[0] = act.astype(o_ref.dtype)

    return kernel


def fused_mlp(new_points, weights, *, eps=1e-5, neg_slope=0.2):
    """new_points: (B, N, C0) f32.  weights: list of (C_out, C_in) f32 Conv1d
    kernels (k=1, squeezed).  Returns (B, N, C_last) f32."""
    B, N, C0 = new_points.shape
    num_layers = len(weights)
    if num_layers == 0:
        return new_points

    # Channels sit on the lane axis -> pad to multiples of 128 (lane-dense
    # stores, fuller MXU contraction).  N sits on the sublane axis -> pad to 16
    # (covers bf16 sublane packing).  Zero padding is exact: padded out-channels
    # stay 0 through norm/LReLU and padded in-channels multiply zero weights.
    chans = [C0] + [int(w.shape[0]) for w in weights]
    chans_p = [_round_up(c, 128) for c in chans]
    n_pad = _round_up(N, 16)

    x = jnp.pad(new_points.astype(jnp.bfloat16),
                ((0, 0), (0, n_pad - N), (0, chans_p[0] - C0)))

    w_padded = []
    for li, w in enumerate(weights):
        c_out, c_in = w.shape
        wp = jnp.pad(w.T.astype(jnp.bfloat16),
                     ((0, chans_p[li] - c_in), (0, chans_p[li + 1] - c_out)))
        w_padded.append(wp)

    in_specs = [pl.BlockSpec((1, n_pad, chans_p[0]), lambda b: (b, 0, 0))]
    for li in range(num_layers):
        in_specs.append(
            pl.BlockSpec((chans_p[li], chans_p[li + 1]), lambda b: (0, 0)))
    out_spec = pl.BlockSpec((1, n_pad, chans_p[-1]), lambda b: (b, 0, 0))

    # Scoped-VMEM budget: 2x in-block + 2x out-block + weights + f32
    # intermediates, with headroom (defaults are 16/32 MiB, far below physical).
    act_f32 = n_pad * max(chans_p) * 4
    est = (2 * n_pad * chans_p[0] * 2 + 2 * n_pad * chans_p[-1] * 4
           + sum(wp.size * 2 for wp in w_padded) + 4 * act_f32 + (4 << 20))
    vmem_limit = int(min(max(est, 32 << 20), 60 << 20))

    kernel = _make_fused_mlp_kernel(num_layers, N, eps, neg_slope)
    out = pl.pallas_call(
        kernel,
        out_shape=jax.ShapeDtypeStruct((B, n_pad, chans_p[-1]), jnp.float32),
        grid_spec=pltpu.PrefetchScalarGridSpec(
            num_scalar_prefetch=0,
            grid=(B,),
            in_specs=in_specs,
            out_specs=out_spec,
        ),
        compiler_params=pltpu.CompilerParams(
            dimension_semantics=("parallel",),
            vmem_limit_bytes=vmem_limit,
        ),
    )(x, *w_padded)
    return out[:, :N, :chans[-1]]


# ----------------------------------------------------------------------------
# Plain-JAX glue matching the PyTorch forward semantics
# ----------------------------------------------------------------------------
def _square_distance(src, dst):
    # src: (B, N, C), dst: (B, S, C) -> (B, N, S)
    cross = jnp.einsum("bnc,bsc->bns", src, dst)
    s1 = jnp.sum(src * src, axis=-1, keepdims=True)           # (B, N, 1)
    s2 = jnp.sum(dst * dst, axis=-1)[:, None, :]               # (B, 1, S)
    return s1 + s2 - 2.0 * cross


def upsample_forward(xyz1, xyz2, features1, features2, params):
    """xyz1: (B,N,3), xyz2: (B,S,3), features1: (B,N,D1) or None,
    features2: (B,S,D2). params: list of (W, b). Returns (B, N, mlp[-1])."""
    B, N, _ = xyz1.shape
    _, S, _ = xyz2.shape

    if S == 1:
        interpolated_points = jnp.tile(features2, (1, N, 1))
    else:
        dists = _square_distance(xyz1, xyz2)                   # (B, N, S)
        # NOTE: top_k tie-breaking may differ from torch.sort on exact ties.
        neg_top, idx = jax.lax.top_k(-dists, 3)                # 3 nearest
        d3 = -neg_top                                          # (B, N, 3) asc.
        dist_recip = 1.0 / (d3 + 1e-8)
        norm = jnp.sum(dist_recip, axis=2, keepdims=True)
        weight = dist_recip / norm                             # (B, N, 3)
        gathered = jnp.take_along_axis(
            features2[:, None, :, :], idx[..., None], axis=2
        )                                                      # (B, N, 3, D2)
        interpolated_points = jnp.sum(gathered * weight[..., None], axis=2)

    if features1 is not None:
        new_points = jnp.concatenate([features1, interpolated_points], axis=-1)
    else:
        new_points = interpolated_points

    # Fused Pallas MLP stack; biases are ignored (exactly cancelled by
    # InstanceNorm1d(affine=False)).
    weights = [w for (w, _b) in params]
    return fused_mlp(new_points, weights)                      # (B, N, mlp[-1])


def init_params(key, in_channel, mlp):
    """Deterministic synthetic Conv1d(k=1) parameters: W (out,in), b (out,)."""
    params = []
    last = in_channel
    for out_ch in mlp:
        key, kw, kb = jax.random.split(key, 3)
        bound = 1.0 / jnp.sqrt(float(last))
        w = jax.random.uniform(kw, (out_ch, last), jnp.float32, -bound, bound)
        b = jax.random.uniform(kb, (out_ch,), jnp.float32, -bound, bound)
        params.append((w, b))
        last = out_ch
    return params


if __name__ == "__main__":
    key = jax.random.PRNGKey(0)
    B, N, S = 2, 16, 8
    D1, D2 = 4, 6
    mlp = [16, 8]

    k0, k1, k2, k3, kp = jax.random.split(key, 5)
    xyz1 = jax.random.normal(k0, (B, N, 3), jnp.float32)
    xyz2 = jax.random.normal(k1, (B, S, 3), jnp.float32)
    features1 = jax.random.normal(k2, (B, N, D1), jnp.float32)
    features2 = jax.random.normal(k3, (B, S, D2), jnp.float32)

    params = init_params(kp, D1 + D2, mlp)

    out = upsample_forward(xyz1, xyz2, features1, features2, params)
    out = jax.block_until_ready(out)
    assert out.shape == (B, N, mlp[-1]), out.shape
    assert jnp.all(jnp.isfinite(out))
    print("KERNEL_OK")
</pallas_src>

<mosaic_0001>
module attributes {stable_mosaic.version = 11 : i64} {
  func.func @kernel(%arg0: i32, %arg1: memref<1x16x128xbf16, #tpu.memory_space<vmem>>, %arg2: memref<128x128xbf16, #tpu.memory_space<vmem>>, %arg3: memref<128x128xbf16, #tpu.memory_space<vmem>>, %arg4: memref<1x16x128xf32, #tpu.memory_space<vmem>>) attributes {dimension_semantics = [#tpu.dimension_semantics<parallel>], iteration_bounds = array<i64: 2>, scalar_prefetch = 0 : i64, scratch_operands = 0 : i64, tpu.core_type = #tpu.core_type<tc>, window_params = [{transform_indices = @transform_0, window_bounds = array<i64: 1, 16, 128>}, {pipeline_mode = #tpu.pipeline_mode<synchronous>, transform_indices = @transform_1, window_bounds = array<i64: 128, 128>}, {pipeline_mode = #tpu.pipeline_mode<synchronous>, transform_indices = @transform_2, window_bounds = array<i64: 128, 128>}, {transform_indices = @transform_3, window_bounds = array<i64: 1, 16, 128>}]} {
    %c0 = arith.constant 0 : index
    %c0_0 = arith.constant 0 : index
    %c0_1 = arith.constant 0 : index
    %0 = vector.load %arg1[%c0, %c0_0, %c0_1] : memref<1x16x128xbf16, #tpu.memory_space<vmem>>, vector<1x16x128xbf16>
    %1 = vector.shape_cast %0 : vector<1x16x128xbf16> to vector<16x128xbf16>
    %2 = tpu.iota {dimensions = array<i32: 0>} : vector<16x1xi32>
    %c16_i32 = arith.constant 16 : i32
    %3 = vector.broadcast %c16_i32 : i32 to vector<16x1xi32>
    %4 = arith.cmpi slt, %2, %3 : vector<16x1xi32>
    %c0_2 = arith.constant 0 : index
    %c0_3 = arith.constant 0 : index
    %5 = vector.load %arg2[%c0_2, %c0_3] : memref<128x128xbf16, #tpu.memory_space<vmem>>, vector<128x128xbf16>
    %cst = arith.constant dense<0.000000e+00> : vector<16x128xf32>
    %6 = tpu.matmul %1, %5, %cst {dimension_numbers = #tpu.dot_dimension_numbers<[1], [0], [0], [1], [0, 0, 1, 1], [], []>} : vector<16x128xbf16>, vector<128x128xbf16>, vector<16x128xf32> -> vector<16x128xf32>
    %cst_4 = arith.constant 0.000000e+00 : f32
    %7 = vector.shape_cast %4 : vector<16x1xi1> to vector<16x1xi1>
    %8 = vector.broadcast %7 : vector<16x1xi1> to vector<16x128xi1>
    %9 = vector.broadcast %cst_4 : f32 to vector<16x128xf32>
    %10 = arith.select %8, %6, %9 : vector<16x128xi1>, vector<16x128xf32>
    %cst_5 = arith.constant dense<0.000000e+00> : vector<128xf32>
    %11 = vector.multi_reduction <add>, %10, %cst_5 [0] : vector<16x128xf32> to vector<128xf32>
    %12 = vector.shape_cast %11 : vector<128xf32> to vector<1x128xf32>
    %cst_6 = arith.constant 6.250000e-02 : f32
    %13 = vector.broadcast %cst_6 : f32 to vector<1x128xf32>
    %14 = arith.mulf %12, %13 : vector<1x128xf32>
    %15 = arith.mulf %10, %10 : vector<16x128xf32>
    %cst_7 = arith.constant dense<0.000000e+00> : vector<128xf32>
    %16 = vector.multi_reduction <add>, %15, %cst_7 [0] : vector<16x128xf32> to vector<128xf32>
    %17 = vector.shape_cast %16 : vector<128xf32> to vector<1x128xf32>
    %cst_8 = arith.constant 6.250000e-02 : f32
    %18 = vector.broadcast %cst_8 : f32 to vector<1x128xf32>
    %19 = arith.mulf %17, %18 : vector<1x128xf32>
    %20 = arith.mulf %14, %14 : vector<1x128xf32>
    %21 = arith.subf %19, %20 : vector<1x128xf32>
    %cst_9 = arith.constant 0.000000e+00 : f32
    %22 = vector.broadcast %cst_9 : f32 to vector<1x128xf32>
    %23 = arith.maximumf %21, %22 : vector<1x128xf32>
    %24 = vector.broadcast %14 : vector<1x128xf32> to vector<16x128xf32>
    %25 = arith.subf %10, %24 : vector<16x128xf32>
    %cst_10 = arith.constant 9.99999974E-6 : f32
    %26 = vector.broadcast %cst_10 : f32 to vector<1x128xf32>
    %27 = arith.addf %23, %26 : vector<1x128xf32>
    %28 = math.rsqrt %27 : vector<1x128xf32>
    %29 = vector.broadcast %28 : vector<1x128xf32> to vector<16x128xf32>
    %30 = arith.mulf %25, %29 : vector<16x128xf32>
    %cst_11 = arith.constant 0.000000e+00 : f32
    %31 = vector.broadcast %cst_11 : f32 to vector<16x128xf32>
    %32 = arith.cmpf ogt, %30, %31 : vector<16x128xf32>
    %cst_12 = arith.constant 2.000000e-01 : f32
    %33 = vector.broadcast %cst_12 : f32 to vector<16x128xf32>
    %34 = arith.mulf %33, %30 : vector<16x128xf32>
    %35 = arith.select %32, %30, %34 : vector<16x128xi1>, vector<16x128xf32>
    %36 = arith.truncf %35 : vector<16x128xf32> to vector<16x128xbf16>
    %c0_13 = arith.constant 0 : index
    %c0_14 = arith.constant 0 : index
    %37 = vector.load %arg3[%c0_13, %c0_14] : memref<128x128xbf16, #tpu.memory_space<vmem>>, vector<128x128xbf16>
    %cst_15 = arith.constant dense<0.000000e+00> : vector<16x128xf32>
    %38 = tpu.matmul %36, %37, %cst_15 {dimension_numbers = #tpu.dot_dimension_numbers<[1], [0], [0], [1], [0, 0, 1, 1], [], []>} : vector<16x128xbf16>, vector<128x128xbf16>, vector<16x128xf32> -> vector<16x128xf32>
    %cst_16 = arith.constant 0.000000e+00 : f32
    %39 = vector.shape_cast %4 : vector<16x1xi1> to vector<16x1xi1>
    %40 = vector.broadcast %39 : vector<16x1xi1> to vector<16x128xi1>
    %41 = vector.broadcast %cst_16 : f32 to vector<16x128xf32>
    %42 = arith.select %40, %38, %41 : vector<16x128xi1>, vector<16x128xf32>
    %cst_17 = arith.constant dense<0.000000e+00> : vector<128xf32>
    %43 = vector.multi_reduction <add>, %42, %cst_17 [0] : vector<16x128xf32> to vector<128xf32>
    %44 = vector.shape_cast %43 : vector<128xf32> to vector<1x128xf32>
    %cst_18 = arith.constant 6.250000e-02 : f32
    %45 = vector.broadcast %cst_18 : f32 to vector<1x128xf32>
    %46 = arith.mulf %44, %45 : vector<1x128xf32>
    %47 = arith.mulf %42, %42 : vector<16x128xf32>
    %cst_19 = arith.constant dense<0.000000e+00> : vector<128xf32>
    %48 = vector.multi_reduction <add>, %47, %cst_19 [0] : vector<16x128xf32> to vector<128xf32>
    %49 = vector.shape_cast %48 : vector<128xf32> to vector<1x128xf32>
    %cst_20 = arith.constant 6.250000e-02 : f32
    %50 = vector.broadcast %cst_20 : f32 to vector<1x128xf32>
    %51 = arith.mulf %49, %50 : vector<1x128xf32>
    %52 = arith.mulf %46, %46 : vector<1x128xf32>
    %53 = arith.subf %51, %52 : vector<1x128xf32>
    %cst_21 = arith.constant 0.000000e+00 : f32
    %54 = vector.broadcast %cst_21 : f32 to vector<1x128xf32>
    %55 = arith.maximumf %53, %54 : vector<1x128xf32>
    %56 = vector.broadcast %46 : vector<1x128xf32> to vector<16x128xf32>
    %57 = arith.subf %42, %56 : vector<16x128xf32>
    %cst_22 = arith.constant 9.99999974E-6 : f32
    %58 = vector.broadcast %cst_22 : f32 to vector<1x128xf32>
    %59 = arith.addf %55, %58 : vector<1x128xf32>
    %60 = math.rsqrt %59 : vector<1x128xf32>
    %61 = vector.broadcast %60 : vector<1x128xf32> to vector<16x128xf32>
    %62 = arith.mulf %57, %61 : vector<16x128xf32>
    %cst_23 = arith.constant 0.000000e+00 : f32
    %63 = vector.broadcast %cst_23 : f32 to vector<16x128xf32>
    %64 = arith.cmpf ogt, %62, %63 : vector<16x128xf32>
    %cst_24 = arith.constant 2.000000e-01 : f32
    %65 = vector.broadcast %cst_24 : f32 to vector<16x128xf32>
    %66 = arith.mulf %65, %62 : vector<16x128xf32>
    %67 = arith.select %64, %62, %66 : vector<16x128xi1>, vector<16x128xf32>
    %c0_25 = arith.constant 0 : index
    %c0_26 = arith.constant 0 : index
    %c0_27 = arith.constant 0 : index
    %68 = vector.load %arg4[%c0_25, %c0_26, %c0_27] : memref<1x16x128xf32, #tpu.memory_space<vmem>>, vector<1x16x128xf32>
    %69 = vector.shape_cast %68 : vector<1x16x128xf32> to vector<16x128xf32>
    %70 = vector.shape_cast %67 : vector<16x128xf32> to vector<1x16x128xf32>
    tpu.vector_store %arg4[%c0_25, %c0_26, %c0_27], %70 {strides = array<i32>} : memref<1x16x128xf32, #tpu.memory_space<vmem>>, vector<1x16x128xf32>,
    return
  }
  func.func @transform_0(%arg0: i32) -> (i32, i32, i32) {
    %c0_i32 = arith.constant 0 : i32
    %c0_i32_0 = arith.constant 0 : i32
    %c0_i32_1 = arith.constant 0 : i32
    return %arg0, %c0_i32, %c0_i32_0 : i32, i32, i32
  }
  func.func @transform_1(%arg0: i32) -> (i32, i32) {
    %c0_i32 = arith.constant 0 : i32
    %c0_i32_0 = arith.constant 0 : i32
    %c0_i32_1 = arith.constant 0 : i32
    return %c0_i32, %c0_i32_0 : i32, i32
  }
  func.func @transform_2(%arg0: i32) -> (i32, i32) {
    %c0_i32 = arith.constant 0 : i32
    %c0_i32_0 = arith.constant 0 : i32
    %c0_i32_1 = arith.constant 0 : i32
    return %c0_i32, %c0_i32_0 : i32, i32
  }
  func.func @transform_3(%arg0: i32) -> (i32, i32, i32) {
    %c0_i32 = arith.constant 0 : i32
    %c0_i32_0 = arith.constant 0 : i32
    %c0_i32_1 = arith.constant 0 : i32
    return %arg0, %c0_i32, %c0_i32_0 : i32, i32, i32
  }
}

</mosaic_0001>

<bundles_post_ra>
// kernel: tpu_custom_call.1
= control target key start
LH: loop header
LB: loop body
LE: loop exit
PB: predicated region body
PF: predicated region fallthrough
CT: control target
= control target key end

     0   :  { %8 = vsyncpa [#allocation3], 0  ;;  %s1249_s0 = inlined_call_operand.hbm [shape: bf16[2,16,128], index: 0, kind: input, shape index: {}]   ;;  %s1250_s1 = inlined_call_operand.hbm [shape: bf16[128,128], index: 1, kind: input, shape index: {}]   ;;  %s1251_s2 = inlined_call_operand.hbm [shape: bf16[128,128], index: 2, kind: input, shape index: {}]   ;;  %s1252_s3 = inlined_call_operand.hbm [shape: f32[2,16,128], index: 3, kind: output, shape index: {}]  }
   0x1   :  { %10 = vsyncpa [#allocation3 + $0x1], 0 }
   0x2   :  { %11 = vsyncpa [#allocation6], 0 }
   0x3   :  { %12 = vsyncpa [#allocation4], 0 }
   0x4   :  { %14 = vsyncpa [#allocation4 + $0x1], 0  ;;  %s1002_s12 = smov 0   ;;  %s1004_s13 = smov 0  }
   0x5   :  { %s1006_s14 = smov 0   ;;  %s1008_s15 = smov 0  }
   0x6 LB: > { %s1023_s16 = sadd.s32 4294967295, %s970_s15   ;;  %s625_s17 = sadd.s32 4294967294, %s970_s15   ;;  %s970_s15 = sphi %s1008_s15, %s1272_s15   ;;  %s966_s14 = sphi %s1006_s14, %s1271_s14   ;;  %s962_s13 = sphi %s1004_s13, %s1270_s13   ;;  %s958_s12 = sphi %s1002_s12, %s1269_s12  }
   0x7   : > { %p40_p0 = scmp.ne.s32.totalorder %s962_s13, %s958_s12  ;;  %p1253_p1 = scmp.eq.s32.totalorder %s1023_s16, 0 }
   0x8   : > { %p112_p3 = scmp.eq.s32.totalorder %s625_s17, 1  ;;  %p626_p5 = scmp.ge.s32.totalorder %s970_s15, 1 }
   0x9   : > { %p1032_p4 = por %p1253_p1, %p40_p0  ;;  %p119_p7 = scmp.lt.s32.totalorder %s970_s15, 3 }
   0xa   : > { %p1037_p6 = por %p112_p3, %p40_p0  ;;  %s972_s21 = smov [#allocation5]  }
   0xb   : > { %s1256_s18 = scalar_select %p1032_p4, 1, 0 }
   0xc   : > { %s1257_s19 = scalar_select %p1037_p6, 1, 0 }
   0xd   : > { %p1042_p8 = pnand %p626_p5, %p119_p7  ;;  %s131_s22 = sshll.u32 %s972_s21, 4  ;;  %s1046_s22 = int_to_ptr.vmem [resolvable:$true] %s131_s22 }
   0xe   : > { %s973_s24 = smov [#allocation7]   ;;  %s814_s28 = scalar_lea.hbm %s1250_s1, 1024 }
   0xf   : > { %p732_p9 = pneg %p1042_p8  ;;  %s144_s25 = sshll.u32 %s973_s24, 4  ;;  %s1057_s25 = int_to_ptr.vmem [resolvable:$true] %s144_s25 }
  0x10   : > { %p815_p12 = scmp.ne.s32.totalorder %s1250_s1, %s814_s28  ;;  %p821_p5 = scmp.lt.u32.totalorder %s814_s28, %s1250_s1 }
  0x11   : > { %p1053_p11 = pnand %p732_p9, %p1253_p1 }
  0x13   : > { %p816_p13 = pneg %p1053_p11 }
  0x15   : > { %p817_p0 = pnand %p816_p13, %p815_p12 }
  0x17   : > { %p818_p3 = pneg %p817_p0 }
  0x19   : > { %p823_p7 = pnand %p821_p5, %p818_p3 }
  0x1b   : > { %826 = shalt.err (!%p823_p7)
}
  0x1c   : > { %s827_s6 = scalar_lea.vmem %s1046_s22, 1024  ;;  %p835_p2 = scmp.lt.s32.totalorder %s1046_s22, %s1046_s22 }
  0x1d   : > { %p828_p9 = scmp.ne.s32.totalorder %s1046_s22, %s827_s6  ;;  %p836_p12 = scmp.lt.s32.totalorder %s827_s6, %s827_s6 }
  0x1f   : > { %p830_p10 = pnand %p828_p9, %p816_p13  ;;  %p837_p0 = por %p836_p12, %p835_p2 }
  0x21   : > { %p831_p1 = pneg %p830_p10 }
  0x23   : > { %p838_p6 = pnand %p837_p0, %p831_p1 }
  0x25   : > { %841 = shalt.err (!%p838_p6)
}
  0x26   : > { %s974_s7 = smov 64   ;;  %s975_s8 = smov 4  }
  0x27   : > { %735 = dma.hbm_to_vmem [thread:$0]  (!%p1053_p11), %s1250_s1, 1024, %s1046_s22, [#allocation6], %s974_s7, %s974_s7, %s975_s8  }
  0x28   : > { %s842_s21 = scalar_lea.hbm %s1251_s2, 1024 }
  0x29   : > { %p843_p1 = scmp.ne.s32.totalorder %s1251_s2, %s842_s21  ;;  %p849_p10 = scmp.lt.u32.totalorder %s842_s21, %s1251_s2 }
  0x2b   : > { %p845_p2 = pnand %p843_p1, %p816_p13 }
  0x2d   : > { %p846_p6 = pneg %p845_p2 }
  0x2f   : > { %p851_p3 = pnand %p849_p10, %p846_p6 }
  0x31   : > { %854 = shalt.err (!%p851_p3)
}
  0x32   : > { %s855_s22 = scalar_lea.vmem %s1057_s25, 1024  ;;  %p863_p12 = scmp.lt.s32.totalorder %s1057_s25, %s1057_s25 }
  0x33   : > { %p856_p5 = scmp.ne.s32.totalorder %s1057_s25, %s855_s22  ;;  %p864_p0 = scmp.lt.s32.totalorder %s855_s22, %s855_s22 }
  0x35   : > { %p858_p7 = pnand %p856_p5, %p816_p13  ;;  %p865_p1 = por %p864_p0, %p863_p12 }
  0x37   : > { %p859_p9 = pneg %p858_p7 }
  0x39   : > { %p866_p2 = pnand %p865_p1, %p859_p9 }
  0x3b   : > { %869 = shalt.err (!%p866_p2)
}
  0x3c   : > { %738 = dma.hbm_to_vmem [thread:$0]  (!%p1053_p11), %s1251_s2, 1024, %s1057_s25, [#allocation6], %s974_s7, %s974_s7, %s975_s8  }
  0x3d   : > { %s1118_s23 = sadd.s32 1, %s970_s15   ;;  %s27_s4 = sadd.s32 1, %s966_s14 }
  0x3e   : > { %s24_s5 = ssub.s32 %s970_s15, %s1118_s23  ;;  %p34_p13 = scmp.ne.s32.totalorder %s966_s14, %s962_s13 }
  0x3f   : > { %p25_p6 = scmp.eq.s32.totalorder %s24_s5, 0  ;;  %p35_p10 = scmp.eq.s32.totalorder %s970_s15, 0 }
  0x40   : > { %p1260_p3 = scmp.eq.s32.totalorder %s1023_s16, 1  ;;  %p749_p7 = scmp.lt.s32.totalorder %s970_s15, 2 }
  0x41   : > { %s1134_s9 = scalar_select %p25_p6, %s966_s14, %s27_s4  }
  0x42   : > { %p1128_p5 = por %p1260_p3, %p34_p13  ;;  %p36_p9 = por %p35_p10, %p34_p13 }
  0x43   : > { %s158_s10 = sand.u32 1, %s966_s14   ;;  %s660_s25 = sshll.u32 %s970_s15, 7 }
  0x44   : > { %s1261_s6 = scalar_select %p1128_p5, 1, 0 }
  0x45   : > { %s630_s11 = sshll.u32 %s158_s10, 3  ;;  %s1141_s24 = scalar_lea.hbm %s1249_s0, %s660_s25 }
  0x46   : > { %s162_s26 = scalar_lea.vmem [#allocation2], %s630_s11  ;;  %p1145_p11 = pnand %p749_p7, %p36_p9 }
  0x47   : > { %s169_s27 = sshll.u32 %s162_s26, 4  ;;  %s1149_s22 = scalar_lea.sflag [#allocation3], %s158_s10  ;;  %s1143_s27 = int_to_ptr.vmem [resolvable:$true] %s169_s27 }
  0x48   : > { %s870_s29 = scalar_lea.hbm %s1141_s24, 128  ;;  %p872_p0 = pneg %p1145_p11 }
  0x49   : > { %p871_p12 = scmp.ne.s32.totalorder %s1141_s24, %s870_s29  ;;  %s875_s5 = scalar_lea.hbm %s1249_s0, 256 }
  0x4a   : > { %p876_p13 = scmp.lt.u32.totalorder %s1141_s24, %s1249_s0  ;;  %p877_p6 = scmp.lt.u32.totalorder %s875_s5, %s870_s29 }
  0x4b   : > { %p873_p1 = pnand %p872_p0, %p871_p12  ;;  %p879_p3 = scmp.lt.u32.totalorder %s870_s29, %s1141_s24 }
  0x4c   : > { %p878_p10 = por %p877_p6, %p876_p13 }
  0x4d   : > { %p874_p2 = pneg %p873_p1 }
  0x4e   : > { %p880_p7 = por %p879_p3, %p878_p10 }
  0x50   : > { %p881_p9 = pnand %p880_p7, %p874_p2 }
  0x52   : > { %884 = shalt.err (!%p881_p9)
}
  0x53   : > { %s885_s10 = scalar_lea.vmem %s1143_s27, 128  ;;  %s976_s17 = smov [#allocation2]  }
  0x54   : > { %p886_p12 = scmp.ne.s32.totalorder %s1143_s27, %s885_s10  ;;  %s890_s21 = sshll.u32 %s976_s17, 4  ;;  %s891_s21 = int_to_ptr.vmem [resolvable:$false] %s890_s21 }
  0x55   : > { %s892_s26 = scalar_lea.vmem %s891_s21, 256  ;;  %p893_p4 = scmp.lt.s32.totalorder %s1143_s27, %s891_s21 }
  0x56   : > { %p888_p1 = pnand %p886_p12, %p872_p0  ;;  %p894_p13 = scmp.lt.s32.totalorder %s892_s26, %s885_s10 }
  0x58   : > { %p889_p5 = pneg %p888_p1  ;;  %p895_p6 = por %p894_p13, %p893_p4 }
  0x5a   : > { %p896_p10 = pnand %p895_p6, %p889_p5 }
  0x5c   : > { %899 = shalt.err (!%p896_p10)
}
  0x5d   : > { %742 = dma.hbm_to_vmem [thread:$0]  (!%p1145_p11), %s1141_s24, 128, %s1143_s27, %s1149_s22, %s974_s7, %s974_s7, %s975_s8  }
  0x5e   : > { %181 = sbr.rel (%p1042_p8) target bundleno = 664 (0x298), region = 32  ;;  %s1183_s29 = sand.u32 (!%p1042_p8), 1, %s962_s13  }
  0x5f   : > { %s634_s30 = sshll.u32 (!%p1042_p8), %s1183_s29, 3  ;;  %s184_s4 = scalar_lea.sflag (!%p1042_p8), [#allocation3], %s1183_s29 }
  0x60   : > { %s1187_s5 = scalar_lea.vmem (!%p1042_p8), [#allocation2], %s634_s30  ;;  %p1263_p4 = scmp.ne.s32.totalorder (!%p1042_p8), %s1256_s18, 0 }
  0x65   : > { %945 = dma.done.wait (%p1263_p4), %s184_s4, 128  }
  0x66   : > { %947 = vsyncadd (%p1263_p4), %s184_s4, 4294967168  ;;  %p1264_p5 = scmp.eq.s32.totalorder %s1023_s16, 0 }
  0x68   : > { %949 = dma.done.wait (%p1264_p5), [#allocation6], 2048   ;;  %p1265_p8 = pmov %p1264_p5 }
  0x69   : > { %v977_v0 = vmov 0.0   ;;  %vm978_vm0 = vmmov 0   ;;  %v793_v1 = vld [vmem:[#allocation5] sm:$0xff]   ;;  %v794_v2 = vld [vmem:[#allocation5 + $0x8] sm:$0xff]   ;;  %v795_v3 = vld [vmem:[#allocation5 + $0x10] sm:$0xff]   ;;  %s637_s18 = sshll.u32 %s1183_s29, 4 }
  0x6a   : > { %951 = vsyncadd (%p1265_p8), [#allocation6], 4294965248  ;;  %680 = vmatprep.subr.bf16.mxu0 %v977_v0  ;;  %696 = vmatprep.mubr.msk.bf16.mxu0 %vm978_vm0, %v977_v0  ;;  %v796_v4 = vld [vmem:[#allocation5 + $0x18] sm:$0xff]   ;;  %v797_v5 = vld [vmem:[#allocation5 + $0x20] sm:$0xff]   ;;  %s661_s20 = sshll.u32 %s1023_s16, 8  ;;  %s217_s7 = scalar_lea.vmem [#allocation8], %s637_s18 }
  0x6b   : > { %700 = vmatprep.subr.bf16.mxu1 %v977_v0  ;;  %716 = vmatprep.mubr.msk.bf16.mxu1 %vm978_vm0, %v977_v0  ;;  %v798_v6 = vld [vmem:[#allocation5 + $0x28] sm:$0xff]   ;;  %v799_v7 = vld [vmem:[#allocation5 + $0x30] sm:$0xff]   ;;  %v800_v8 = vld [vmem:[#allocation5 + $0x38] sm:$0xff]   ;;  %s533_s8 = sshll.u32 %s217_s7, 4  ;;  %s1203_s28 = scalar_lea.hbm %s1252_s3, %s661_s20  ;;  %s1205_s8 = int_to_ptr.vmem [resolvable:$true] %s533_s8 }
  0x6c   : > { %681 = vmatpush3.bf16.msra.mxu0 %v793_v1  ;;  %v801_v9 = vld [vmem:[%s1187_s5] sm:$0xff]   ;;  %v802_v10 = vld [vmem:[#allocation7] sm:$0xff]   ;;  %v803_v11 = vld [vmem:[#allocation7 + $0x8] sm:$0xff]   ;;  %s520_s16 = scalar_lea.sflag [#allocation4], %s1183_s29  ;;  %s900_s22 = scalar_lea.vmem %s1205_s8, 256 }
  0x6d   : > { %682 = vmatprep.subr.bf16.mxu0 %v977_v0  ;;  %701 = vmatpush3.bf16.msra.mxu1 %v802_v10  ;;  %v804_v12 = vld [vmem:[#allocation7 + $0x10] sm:$0xff]   ;;  %v805_v13 = vld [vmem:[#allocation7 + $0x18] sm:$0xff]   ;;  %v806_v14 = vld [vmem:[#allocation7 + $0x20] sm:$0xff]   ;;  %p901_p11 = scmp.ne.s32.totalorder %s1205_s8, %s900_s22  ;;  %p1266_p0 = scmp.ne.s32.totalorder %s1261_s6, 0 }
  0x6e   : > { %702 = vmatprep.subr.bf16.mxu1 %v977_v0  ;;  %v807_v15 = vld [vmem:[#allocation7 + $0x28] sm:$0xff]   ;;  %v808_v16 = vld [vmem:[#allocation7 + $0x30] sm:$0xff]   ;;  %v809_v17 = vld [vmem:[#allocation7 + $0x38] sm:$0xff]   ;;  %s979_s11 = smov [#allocation8]  }
  0x6f   : > { %p902_p2 = pnand %p901_p11, %p1266_p0  ;;  %s904_s25 = sshll.u32 %s979_s11, 4  ;;  %s905_s25 = int_to_ptr.vmem [resolvable:$false] %s904_s25 }
  0x70   : > { %683 = vmatpush3.bf16.msra.mxu0 %v794_v2  ;;  %s906_s10 = scalar_lea.vmem %s905_s25, 512  ;;  %p907_p7 = scmp.lt.s32.totalorder %s1205_s8, %s905_s25 }
  0x71   : > { %684 = vmatprep.subr.bf16.mxu0 %v977_v0  ;;  %703 = vmatpush3.bf16.msra.mxu1 %v803_v11  ;;  %p903_p3 = pneg %p902_p2  ;;  %p908_p9 = scmp.lt.s32.totalorder %s906_s10, %s900_s22 }
  0x72   : > { %704 = vmatprep.subr.bf16.mxu1 %v977_v0 }
  0x73   : > { %p909_p12 = por %p908_p9, %p907_p7 }
  0x74   : > { %685 = vmatpush3.bf16.msra.mxu0 %v795_v3 }
  0x75   : > { %686 = vmatprep.subr.bf16.mxu0 %v977_v0  ;;  %705 = vmatpush3.bf16.msra.mxu1 %v804_v12  ;;  %p910_p1 = pnand %p909_p12, %p903_p3 }
  0x76   : > { %706 = vmatprep.subr.bf16.mxu1 %v977_v0 }
  0x78   : > { %687 = vmatpush3.bf16.msra.mxu0 %v796_v4 }
  0x79   : > { %688 = vmatprep.subr.bf16.mxu0 %v977_v0  ;;  %707 = vmatpush3.bf16.msra.mxu1 %v805_v13 }
  0x7a   : > { %708 = vmatprep.subr.bf16.mxu1 %v977_v0 }
  0x7c   : > { %689 = vmatpush3.bf16.msra.mxu0 %v797_v5 }
  0x7d   : > { %690 = vmatprep.subr.bf16.mxu0 %v977_v0  ;;  %709 = vmatpush3.bf16.msra.mxu1 %v806_v14 }
  0x7e   : > { %710 = vmatprep.subr.bf16.mxu1 %v977_v0 }
  0x80   : > { %691 = vmatpush3.bf16.msra.mxu0 %v798_v6 }
  0x81   : > { %692 = vmatprep.subr.bf16.mxu0 %v977_v0  ;;  %711 = vmatpush3.bf16.msra.mxu1 %v807_v15 }
  0x82   : > { %712 = vmatprep.subr.bf16.mxu1 %v977_v0 }
  0x84   : > { %693 = vmatpush3.bf16.msra.mxu0 %v799_v7 }
  0x85   : > { %694 = vmatprep.subr.bf16.mxu0 %v977_v0  ;;  %713 = vmatpush3.bf16.msra.mxu1 %v808_v16 }
  0x86   : > { %714 = vmatprep.subr.bf16.mxu1 %v977_v0 }
  0x88   : > { %695 = vmatpush3.bf16.msra.mxu0 %v800_v8 }
  0x89   : > { %715 = vmatpush3.bf16.msra.mxu1 %v809_v17 }
  0x8b   : > { %697 = vmatmul.mubr.bf16.vlgmr.msra.gmra.mrb[0].mxu0 %v801_v9 }
 0x15e   : > { %v330_v18 = vpop.f32.mrb[0].mxu0 }
 0x15f   : > { %v698_v19 = vpop.f32.mrb[1].mxu0  ;;  %v351_v21 = vmul.f32 %v330_v18, %v330_v18 }
 0x160   : > { %v333_v20 = vpop.f32.mrb[2].mxu0 }
 0x161   : > { %v343_v22 = vadd.f32 %v333_v20, %v330_v18  ;;  %v352_v23 = vmul.f32 %v333_v20, %v333_v20  ;;  %v699_v24 = vpop.f32.mrb[3].mxu0 }
 0x163   : > { %v344_v25 = vrot.slane %v343_v22, 4  ;;  %v353_v26 = vadd.f32 %v352_v23, %v351_v21 }
 0x165   : > { %v345_v27 = vadd.f32 %v344_v25, %v343_v22  ;;  %v354_v28 = vrot.slane %v353_v26, 4 }
 0x167   : > { %v346_v29 = vrot.slane %v345_v27, 2  ;;  %v355_v30 = vadd.f32 %v354_v28, %v353_v26 }
 0x169   : > { %v347_v31 = vadd.f32 %v346_v29, %v345_v27  ;;  %v356_v32 = vrot.slane %v355_v30, 2 }
 0x16b   : > { %v348_v33 = vrot.slane %v347_v31, 1  ;;  %v357_v34 = vadd.f32 %v356_v32, %v355_v30 }
 0x16d   : > { %v349_v35 = vadd.f32 %v348_v33, %v347_v31  ;;  %v358_v36 = vrot.slane %v357_v34, 1 }
 0x16f   : > { %v350_v37 = vmul.f32 0.0625, %v349_v35  ;;  %v359_v38 = vadd.f32 %v358_v36, %v357_v34 }
 0x171   : > { %v360_v39 = vmul.f32 0.0625, %v359_v38  ;;  %v361_v40 = vmul.f32 %v350_v37, %v350_v37  ;;  %v365_v41 = vsub.f32 %v333_v20, %v350_v37  ;;  %v364_v42 = vsub.f32 %v330_v18, %v350_v37 }
 0x173   : > { %v362_v43 = vsub.f32 %v360_v39, %v361_v40 }
 0x175   : > { %v363_v44 = vmax.f32 %v362_v43, 0.0 }
 0x177   : > { %v366_v45 = vadd.f32 1e-05, %v363_v44 }
 0x179   : > { %810 = vrsqrt.f32 %v366_v45 }
 0x183   : > { %v811_v46 = vpop.eup %810 }
 0x184   : > { %v369_v47 = vmul.f32 %v811_v46, %v365_v41  ;;  %v368_v48 = vmul.f32 %v811_v46, %v364_v42 }
 0x186   : > { %vm370_vm1 = vcmp.gt.f32.partialorder %v368_v48, 0.0  ;;  %vm371_vm2 = vcmp.gt.f32.partialorder %v369_v47, 0.0  ;;  %v372_v49 = vmul.f32 0.2, %v368_v48  ;;  %v373_v50 = vmul.f32 0.2, %v369_v47 }
 0x188   : > { %v374_v51 = vsel %vm370_vm1, %v368_v48, %v372_v49  ;;  %v375_v52 = vsel %vm371_vm2, %v369_v47, %v373_v50 }
 0x189   : > { %v376_v53 = vpack.c.bf16 %v375_v52, %v374_v51 }
 0x18b   : > { %717 = vmatmul.mubr.bf16.vlgmr.msra.gmra.mrb[0].mxu1 %v376_v53 }
 0x25e   : > { %v475_v54 = vpop.f32.mrb[0].mxu1 }
 0x25f   : > { %v718_v55 = vpop.f32.mrb[1].mxu1  ;;  %v492_v57 = vmul.f32 %v475_v54, %v475_v54 }
 0x260   : > { %v478_v56 = vpop.f32.mrb[2].mxu1 }
 0x261   : > { %v484_v58 = vadd.f32 %v478_v56, %v475_v54  ;;  %v493_v59 = vmul.f32 %v478_v56, %v478_v56  ;;  %v719_v60 = vpop.f32.mrb[3].mxu1 }
 0x263   : > { %v485_v61 = vrot.slane %v484_v58, 4  ;;  %v494_v62 = vadd.f32 %v493_v59, %v492_v57 }
 0x265   : > { %v486_v63 = vadd.f32 %v485_v61, %v484_v58  ;;  %v495_v0 = vrot.slane %v494_v62, 4 }
 0x267   : > { %v487_v1 = vrot.slane %v486_v63, 2  ;;  %v496_v2 = vadd.f32 %v495_v0, %v494_v62 }
 0x269   : > { %v488_v3 = vadd.f32 %v487_v1, %v486_v63  ;;  %v497_v4 = vrot.slane %v496_v2, 2 }
 0x26b   : > { %v489_v5 = vrot.slane %v488_v3, 1  ;;  %v498_v6 = vadd.f32 %v497_v4, %v496_v2 }
 0x26d   : > { %v490_v7 = vadd.f32 %v489_v5, %v488_v3  ;;  %v499_v8 = vrot.slane %v498_v6, 1 }
 0x26f   : > { %v491_v9 = vmul.f32 0.0625, %v490_v7  ;;  %v500_v10 = vadd.f32 %v499_v8, %v498_v6 }
 0x271   : > { %v501_v11 = vmul.f32 0.0625, %v500_v10  ;;  %v502_v12 = vmul.f32 %v491_v9, %v491_v9  ;;  %v505_v13 = vsub.f32 %v475_v54, %v491_v9  ;;  %v506_v14 = vsub.f32 %v478_v56, %v491_v9 }
 0x273   : > { %v503_v15 = vsub.f32 %v501_v11, %v502_v12 }
 0x275   : > { %v504_v16 = vmax.f32 %v503_v15, 0.0 }
 0x277   : > { %v507_v17 = vadd.f32 1e-05, %v504_v16 }
 0x279   : > { %812 = vrsqrt.f32 %v507_v17 }
 0x283   : > { %v813_v18 = vpop.eup %812 }
 0x284   : > { %v509_v19 = vmul.f32 %v813_v18, %v505_v13  ;;  %v510_v20 = vmul.f32 %v813_v18, %v506_v14 }
 0x286   : > { %vm511_vm3 = vcmp.gt.f32.partialorder %v509_v19, 0.0  ;;  %vm512_vm4 = vcmp.gt.f32.partialorder %v510_v20, 0.0  ;;  %v513_v21 = vmul.f32 0.2, %v509_v19  ;;  %v514_v22 = vmul.f32 0.2, %v510_v20 }
 0x288   : > { %v516_v23 = vsel %vm512_vm4, %v510_v20, %v514_v22  ;;  %v515_v24 = vsel %vm511_vm3, %v509_v19, %v513_v21 }
 0x289   : > { %518 = vst [vmem:[%s217_s7 + $0x8] sm:$0xff] %v516_v23  ;;  %517 = vst [vmem:[%s217_s7] sm:$0xff] %v515_v24 }
 0x28a   : > { %913 = shalt.err (!%p910_p1)
}
 0x28b   : > { %s914_s17 = scalar_lea.hbm %s1203_s28, 256  ;;  %s918_s30 = scalar_lea.hbm %s1252_s3, 512 }
 0x28c   : > { %p915_p13 = scmp.ne.s32.totalorder %s1203_s28, %s914_s17  ;;  %p919_p4 = scmp.lt.u32.totalorder %s1203_s28, %s1252_s3 }
 0x28d   : > { %p920_p5 = scmp.lt.u32.totalorder %s918_s30, %s914_s17  ;;  %p922_p11 = scmp.lt.u32.totalorder %s914_s17, %s1203_s28 }
 0x28e   : > { %p916_p6 = pnand %p915_p13, %p1266_p0 }
 0x28f   : > { %p921_p8 = por %p920_p5, %p919_p4 }
 0x290   : > { %p917_p10 = pneg %p916_p6 }
 0x291   : > { %p923_p2 = por %p922_p11, %p921_p8 }
 0x293   : > { %p924_p3 = pnand %p923_p2, %p917_p10 }
 0x295   : > { %927 = shalt.err (!%p924_p3)
}
 0x296   : > { %s980_s18 = smov 128   ;;  %s981_s20 = smov 8  }
 0x297   : > { %730 = dma.vmem_to_hbm [thread:$0]  (%p1266_p0), %s1205_s8, 256, %s1203_s28, %s520_s16, %s980_s18, %s980_s18, %s981_s20  }
 0x298 PF: > { %s548_s7 = sand.u32 1, %s958_s12   ;;  %p1267_p7 = scmp.ne.s32.totalorder %s1257_s19, 0 }
 0x299   : > { %p1268_p9 = scmp.ge.s32.totalorder %s970_s15, 2  ;;  %s549_s24 = scalar_lea.sflag [#allocation4], %s548_s7 }
 0x29b   : > { %p744_p12 = pnand %p1268_p9, %p1267_p7 }
 0x29d   : > { %953 = dma.done.wait (!%p744_p12), %s549_s24, 256  }
 0x29e   : > { %955 = vsyncadd (!%p744_p12), %s549_s24, 4294967040  ;;  %p17_p1 = scmp.ge.s32.totalorder %s1118_s23, 4   ;;  %s1269_s12 = smov %s962_s13 }
 0x29f   : > { %s1270_s13 = smov %s966_s14  ;;  %s1271_s14 = smov %s1134_s9 }
 0x2a0   : > { %s1272_s15 = smov %s1118_s23  ;;  %19 = sbr.rel (!%p17_p1) target bundleno = 6 (0x6), region = 85 }
 0x2a7   :  { %554 = vsyncpa [#allocation3], 1 }
 0x2a8   :  { %556 = vsyncpa [#allocation3 + $0x1], 1 }
 0x2a9   :  { %557 = vsyncpa [#allocation6], 1 }
 0x2aa   :  { %558 = vsyncpa [#allocation4], 1 }
 0x2ab   :  { %560 = vsyncpa [#allocation4 + $0x1], 1 }

</bundles_post_ra>
